<compile_context>
chip_gen: v7x
topology: tpu7x:2x2x1
jax: 0.10.0
libtpu: 0.0.40
codegen_flags: <defaults>
</compile_context>

<pallas_src>
import math

import jax
import jax.numpy as jnp
from jax import lax
from jax.experimental import pallas as pl
from jax.experimental.pallas import tpu as pltpu


def spatial_attention_kernel(
    q_ref,      # (L, K)      query for this grid instance
    pos_ref,    # (L, K)      positional-embedding rows 0..L-1 (resident)
    w_ref,      # (K, 2K+1)   fused [W_q*s | W_k | W_v@W_o]   (resident)
    b_ref,      # (1, 2K+1)   fused [b_q*s | b_k | b_v@W_o+b_o]
    out_ref,    # (1, L)      attn_output as a lane-dense row
    probs_ref,  # (L, L)      attn_probs2
):
    k_dim = q_ref.shape[1]

    # Positional embedding add:  q_enc2 = query + pos_emb
    q_enc = q_ref[...] + pos_ref[...]                                   # (L, K)

    # Single fused projection on the MXU: [q2*s | k2 | v_out] = q_enc @ W + b
    proj = jnp.dot(q_enc, w_ref[...],
                   preferred_element_type=jnp.float32) + b_ref[...]     # (L, 2K+1)
    q2 = proj[:, :k_dim]                 # already scaled by 1/sqrt(k)
    k2 = proj[:, k_dim:2 * k_dim]
    v_out = proj[:, 2 * k_dim:]          # (L, 1) == (q_enc @ W_v + b_v) @ W_o + b_o

    # attn_scores = (q2/sqrt(k)) @ k2^T  — trans_b contraction, no k2 transpose.
    scores = lax.dot_general(
        q2, k2,
        dimension_numbers=(((1,), (1,)), ((), ())),
        preferred_element_type=jnp.float32,
    )                                                                   # (L, L)

    # softmax over last dim (numerically stable).  approx=False keeps the
    # reciprocal exact (tolerance-critical; EUP is nowhere near a bottleneck).
    m = jnp.max(scores, axis=-1, keepdims=True)
    e = jnp.exp(scores - m)
    probs = e * pl.reciprocal(jnp.sum(e, axis=-1, keepdims=True), approx=False)
    probs_ref[...] = probs

    # attn_output row:  out[0, q] = sum_j v_out[j, 0] * probs[q, j]
    #   == (probs @ v_out)^T, emitted lane-dense as (1, L).
    out_ref[...] = lax.dot_general(
        v_out, probs,
        dimension_numbers=(((0,), (1,)), ((), ())),
        preferred_element_type=jnp.float32,
    )                                                                   # (1, L)


def prepare_params(params, seq_len):
    """One-time weight transform: scale-fold + QK/VO fusion."""
    pos_tab, wq, bq, wk, bk, wv, bv, wo, bo = params
    K = wq.shape[0]
    s = jnp.float32(1.0 / math.sqrt(K))
    wvo = wv @ wo                 # (K, 1)
    bvo = bv @ wo + bo            # (1, 1)  (b_o folded: softmax rows sum to 1)
    w_fused = jnp.concatenate([wq * s, wk, wvo], axis=1)   # (K, 2K+1)
    b_fused = jnp.concatenate([bq * s, bk, bvo], axis=1)   # (1, 2K+1)
    return pos_tab[:seq_len], w_fused, b_fused


def spatial_attention_batched(queries, params):
    """queries: (B, L, K) float32.  Returns (attn (B, L), probs (B, L, L))."""
    B, L, K = queries.shape
    pos, w_fused, b_fused = prepare_params(params, L)
    F = w_fused.shape[1]

    attn, probs = pl.pallas_call(
        spatial_attention_kernel,
        out_shape=(
            jax.ShapeDtypeStruct((B, 1, L), jnp.float32),
            jax.ShapeDtypeStruct((B, L, L), jnp.float32),
        ),
        grid=(B,),
        in_specs=[
            pl.BlockSpec((None, L, K), lambda b: (b, 0, 0)),   # per-instance query
            pl.BlockSpec((L, K), lambda b: (0, 0)),            # pos table (resident)
            pl.BlockSpec((K, F), lambda b: (0, 0)),            # fused weights (resident)
            pl.BlockSpec((1, F), lambda b: (0, 0)),            # fused biases (resident)
        ],
        out_specs=(
            pl.BlockSpec((None, 1, L), lambda b: (b, 0, 0)),   # lane-dense attn row
            pl.BlockSpec((None, L, L), lambda b: (b, 0, 0)),
        ),
        compiler_params=pltpu.CompilerParams(
            dimension_semantics=("parallel",)),   # shards batch across TCs on v7x
    )(queries, pos, w_fused, b_fused)

    return attn[:, 0, :], probs


def spatial_attention(query, params):
    """Single-instance API matching the module: query (L, K) -> ((L,), (L, L))."""
    attn, probs = spatial_attention_batched(query[None], params)
    return attn[0], probs[0]


def init_params(key, d_model, k):
    """Deterministic synthetic parameters matching the module's __init__ shapes."""
    ks = jax.random.split(key, 9)
    # nn.Embedding(d_model, k) table
    pos_tab = jax.random.normal(ks[0], (d_model, k), jnp.float32)
    # nn.Linear(k, k) x3 — stored pre-transposed as (in, out); biases as (1, out)
    bound = 1.0 / math.sqrt(k)
    u = lambda kk, shape: jax.random.uniform(kk, shape, jnp.float32, -bound, bound)
    wq, bq = u(ks[1], (k, k)), u(ks[2], (1, k))
    wk, bk = u(ks[3], (k, k)), u(ks[4], (1, k))
    wv, bv = u(ks[5], (k, k)), u(ks[6], (1, k))
    # nn.Linear(k, 1) — pre-transposed (k, 1); bias (1, 1)
    wo, bo = u(ks[7], (k, 1)), u(ks[8], (1, 1))
    return (pos_tab, wq, bq, wk, bk, wv, bv, wo, bo)


def reference(query, params):
    """Pure-JAX reference mirroring the original PyTorch forward (mask=None)."""
    pos_tab, wq, bq, wk, bk, wv, bv, wo, bo = params
    L, K = query.shape
    q_enc = query + pos_tab[:L]
    q2 = q_enc @ wq + bq
    k2 = q_enc @ wk + bk
    v2 = q_enc @ wv + bv
    scores = (q2 @ k2.T) / math.sqrt(K)
    probs = jax.nn.softmax(scores, axis=-1)
    out = probs @ v2
    attn = (out @ wo + bo)[:, 0]
    return attn, probs


if __name__ == "__main__":
    d_model = 16   # sequence/positional axis length
    k = 5          # per-position feature count (module's top-k)
    batch = 4      # number of independent instances run over the parallel grid

    key = jax.random.PRNGKey(0)
    k_q, k_p = jax.random.split(key)
    queries = jax.random.normal(k_q, (batch, d_model, k), jnp.float32)
    params = init_params(k_p, d_model, k)

    # Batched path (grid over instances).
    attn_b, probs_b = spatial_attention_batched(queries, params)
    jax.block_until_ready((attn_b, probs_b))
    assert attn_b.shape == (batch, d_model)
    assert probs_b.shape == (batch, d_model, d_model)

    for i in range(batch):
        r_out, r_probs = reference(queries[i], params)
        assert jnp.allclose(attn_b[i], r_out, atol=2e-5, rtol=2e-5)
        assert jnp.allclose(probs_b[i], r_probs, atol=2e-5, rtol=2e-5)

    # Single-instance path matching the module's forward signature.
    attn_s, probs_s = spatial_attention(queries[0], params)
    jax.block_until_ready((attn_s, probs_s))
    r_out0, r_probs0 = reference(queries[0], params)
    assert attn_s.shape == (d_model,)
    assert probs_s.shape == (d_model, d_model)
    assert jnp.allclose(attn_s, r_out0, atol=2e-5, rtol=2e-5)
    assert jnp.allclose(probs_s, r_probs0, atol=2e-5, rtol=2e-5)

    print("KERNEL_OK")
</pallas_src>

<mosaic_0001>
module attributes {stable_mosaic.version = 11 : i64} {
  func.func @spatial_attention_kernel(%arg0: i32, %arg1: memref<1x16x5xf32, #tpu.memory_space<vmem>>, %arg2: memref<16x5xf32, #tpu.memory_space<vmem>>, %arg3: memref<5x11xf32, #tpu.memory_space<vmem>>, %arg4: memref<1x11xf32, #tpu.memory_space<vmem>>, %arg5: memref<1x1x16xf32, #tpu.memory_space<vmem>>, %arg6: memref<1x16x16xf32, #tpu.memory_space<vmem>>) attributes {dimension_semantics = [#tpu.dimension_semantics<parallel>], iteration_bounds = array<i64: 4>, scalar_prefetch = 0 : i64, scratch_operands = 0 : i64, tpu.core_type = #tpu.core_type<tc>, window_params = [{transform_indices = @transform_0, window_bounds = array<i64: 1, 16, 5>}, {pipeline_mode = #tpu.pipeline_mode<synchronous>, transform_indices = @transform_1, window_bounds = array<i64: 16, 5>}, {pipeline_mode = #tpu.pipeline_mode<synchronous>, transform_indices = @transform_2, window_bounds = array<i64: 5, 11>}, {pipeline_mode = #tpu.pipeline_mode<synchronous>, transform_indices = @transform_3, window_bounds = array<i64: 1, 11>}, {transform_indices = @transform_4, window_bounds = array<i64: 1, 1, 16>}, {transform_indices = @transform_5, window_bounds = array<i64: 1, 16, 16>}]} {
    %c0 = arith.constant 0 : index
    %c0_0 = arith.constant 0 : index
    %c0_1 = arith.constant 0 : index
    %0 = vector.load %arg1[%c0, %c0_0, %c0_1] : memref<1x16x5xf32, #tpu.memory_space<vmem>>, vector<1x16x5xf32>
    %1 = vector.shape_cast %0 : vector<1x16x5xf32> to vector<16x5xf32>
    %c0_2 = arith.constant 0 : index
    %c0_3 = arith.constant 0 : index
    %2 = vector.load %arg2[%c0_2, %c0_3] : memref<16x5xf32, #tpu.memory_space<vmem>>, vector<16x5xf32>
    %3 = arith.addf %1, %2 : vector<16x5xf32>
    %c0_4 = arith.constant 0 : index
    %c0_5 = arith.constant 0 : index
    %4 = vector.load %arg3[%c0_4, %c0_5] : memref<5x11xf32, #tpu.memory_space<vmem>>, vector<5x11xf32>
    %cst = arith.constant dense<0.000000e+00> : vector<16x11xf32>
    %5 = tpu.matmul %3, %4, %cst {dimension_numbers = #tpu.dot_dimension_numbers<[1], [0], [0], [1], [0, 0, 1, 1], [], []>} : vector<16x5xf32>, vector<5x11xf32>, vector<16x11xf32> -> vector<16x11xf32>
    %c0_6 = arith.constant 0 : index
    %c0_7 = arith.constant 0 : index
    %6 = vector.load %arg4[%c0_6, %c0_7] : memref<1x11xf32, #tpu.memory_space<vmem>>, vector<1x11xf32>
    %7 = vector.broadcast %6 : vector<1x11xf32> to vector<16x11xf32>
    %8 = arith.addf %5, %7 : vector<16x11xf32>
    %9 = vector.extract_strided_slice %8 {offsets = [0, 0], sizes = [16, 5], strides = [1, 1]} : vector<16x11xf32> to vector<16x5xf32>
    %10 = vector.extract_strided_slice %8 {offsets = [0, 5], sizes = [16, 5], strides = [1, 1]} : vector<16x11xf32> to vector<16x5xf32>
    %11 = vector.extract_strided_slice %8 {offsets = [0, 10], sizes = [16, 1], strides = [1, 1]} : vector<16x11xf32> to vector<16x1xf32>
    %cst_8 = arith.constant dense<0.000000e+00> : vector<16x16xf32>
    %12 = tpu.matmul %9, %10, %cst_8 {dimension_numbers = #tpu.dot_dimension_numbers<[1], [1], [0], [0], [0, 0, 1, 0], [], []>} : vector<16x5xf32>, vector<16x5xf32>, vector<16x16xf32> -> vector<16x16xf32>
    %cst_9 = arith.constant dense<0xFF800000> : vector<16xf32>
    %13 = vector.multi_reduction <maximumf>, %12, %cst_9 [1] : vector<16x16xf32> to vector<16xf32>
    %14 = vector.shape_cast %13 : vector<16xf32> to vector<16x1xf32>
    %15 = vector.broadcast %14 : vector<16x1xf32> to vector<16x16xf32>
    %16 = arith.subf %12, %15 : vector<16x16xf32>
    %17 = math.exp %16 : vector<16x16xf32>
    %cst_10 = arith.constant dense<0.000000e+00> : vector<16xf32>
    %18 = vector.multi_reduction <add>, %17, %cst_10 [1] : vector<16x16xf32> to vector<16xf32>
    %19 = vector.shape_cast %18 : vector<16xf32> to vector<16x1xf32>
    %20 = tpu.reciprocal %19 : vector<16x1xf32> -> vector<16x1xf32>
    %21 = vector.broadcast %20 : vector<16x1xf32> to vector<16x16xf32>
    %22 = arith.mulf %17, %21 : vector<16x16xf32>
    %c0_11 = arith.constant 0 : index
    %c0_12 = arith.constant 0 : index
    %c0_13 = arith.constant 0 : index
    %23 = vector.load %arg6[%c0_11, %c0_12, %c0_13] : memref<1x16x16xf32, #tpu.memory_space<vmem>>, vector<1x16x16xf32>
    %24 = vector.shape_cast %23 : vector<1x16x16xf32> to vector<16x16xf32>
    %25 = vector.shape_cast %22 : vector<16x16xf32> to vector<1x16x16xf32>
    tpu.vector_store %arg6[%c0_11, %c0_12, %c0_13], %25 {strides = array<i32>} : memref<1x16x16xf32, #tpu.memory_space<vmem>>, vector<1x16x16xf32>,
    %cst_14 = arith.constant dense<0.000000e+00> : vector<1x16xf32>
    %26 = tpu.matmul %11, %22, %cst_14 {dimension_numbers = #tpu.dot_dimension_numbers<[0], [1], [1], [0], [0, 1, 1, 0], [], []>} : vector<16x1xf32>, vector<16x16xf32>, vector<1x16xf32> -> vector<1x16xf32>
    %c0_15 = arith.constant 0 : index
    %c0_16 = arith.constant 0 : index
    %c0_17 = arith.constant 0 : index
    %27 = vector.load %arg5[%c0_15, %c0_16, %c0_17] : memref<1x1x16xf32, #tpu.memory_space<vmem>>, vector<1x1x16xf32>
    %28 = vector.shape_cast %27 : vector<1x1x16xf32> to vector<1x16xf32>
    %29 = vector.shape_cast %26 : vector<1x16xf32> to vector<1x1x16xf32>
    tpu.vector_store %arg5[%c0_15, %c0_16, %c0_17], %29 {strides = array<i32>} : memref<1x1x16xf32, #tpu.memory_space<vmem>>, vector<1x1x16xf32>,
    return
  }
  func.func @transform_0(%arg0: i32) -> (i32, i32, i32) {
    %c0_i32 = arith.constant 0 : i32
    %c0_i32_0 = arith.constant 0 : i32
    %c0_i32_1 = arith.constant 0 : i32
    return %arg0, %c0_i32, %c0_i32_0 : i32, i32, i32
  }
  func.func @transform_1(%arg0: i32) -> (i32, i32) {
    %c0_i32 = arith.constant 0 : i32
    %c0_i32_0 = arith.constant 0 : i32
    %c0_i32_1 = arith.constant 0 : i32
    return %c0_i32, %c0_i32_0 : i32, i32
  }
  func.func @transform_2(%arg0: i32) -> (i32, i32) {
    %c0_i32 = arith.constant 0 : i32
    %c0_i32_0 = arith.constant 0 : i32
    %c0_i32_1 = arith.constant 0 : i32
    return %c0_i32, %c0_i32_0 : i32, i32
  }
  func.func @transform_3(%arg0: i32) -> (i32, i32) {
    %c0_i32 = arith.constant 0 : i32
    %c0_i32_0 = arith.constant 0 : i32
    %c0_i32_1 = arith.constant 0 : i32
    return %c0_i32, %c0_i32_0 : i32, i32
  }
  func.func @transform_4(%arg0: i32) -> (i32, i32, i32) {
    %c0_i32 = arith.constant 0 : i32
    %c0_i32_0 = arith.constant 0 : i32
    %c0_i32_1 = arith.constant 0 : i32
    return %arg0, %c0_i32, %c0_i32_0 : i32, i32, i32
  }
  func.func @transform_5(%arg0: i32) -> (i32, i32, i32) {
    %c0_i32 = arith.constant 0 : i32
    %c0_i32_0 = arith.constant 0 : i32
    %c0_i32_1 = arith.constant 0 : i32
    return %arg0, %c0_i32, %c0_i32_0 : i32, i32, i32
  }
}

</mosaic_0001>

<bundles_post_ra>
// kernel: tpu_custom_call.1
= control target key start
LH: loop header
LB: loop body
LE: loop exit
PB: predicated region body
PF: predicated region fallthrough
CT: control target
= control target key end

     0   :  { %11 = vsyncpa [#allocation3], 0  ;;  %s1115_s0 = inlined_call_operand.vmem [shape: f32[4,16,5], index: 0, kind: input, shape index: {}]   ;;  %s1116_s1 = inlined_call_operand.vmem [shape: f32[16,5], index: 1, kind: input, shape index: {}]   ;;  %s1117_s2 = inlined_call_operand.vmem [shape: f32[5,11], index: 2, kind: input, shape index: {}]   ;;  %s1118_s3 = inlined_call_operand.vmem [shape: f32[1,11], index: 3, kind: input, shape index: {}]   ;;  %s1119_s4 = inlined_call_operand.hbm [shape: f32[4,1,16], index: 4, kind: output, shape index: {0}]   ;;  %s1120_s5 = inlined_call_operand.hbm [shape: f32[4,16,16], index: 5, kind: output, shape index: {1}]  }
   0x1   :  { %13 = vsyncpa [#allocation3 + $0x1], 0 }
   0x2   :  { %14 = vsyncpa [#allocation5], 0 }
   0x3   :  { %16 = vsyncpa [#allocation5 + $0x1], 0  ;;  %s951_s18 = smov 0   ;;  %s953_s19 = smov 0  }
   0x4   :  { %s955_s20 = smov 0   ;;  %s957_s21 = smov 0  }
   0x5 LB: > { %s972_s22 = sadd.s32 4294967295, %s910_s21   ;;  %s687_s23 = sadd.s32 4294967294, %s910_s21   ;;  %s910_s21 = sphi %s957_s21, %s1126_s21   ;;  %s906_s20 = sphi %s955_s20, %s1125_s20   ;;  %s902_s19 = sphi %s953_s19, %s1124_s19   ;;  %s898_s18 = sphi %s951_s18, %s1123_s18  }
   0x6   : > { %s976_s24 = sadd.s32 1, %s910_s21   ;;  %s118_s25 = sadd.s32 1, %s906_s20 }
   0x7   : > { %s115_s26 = ssub.s32 %s910_s21, %s976_s24  ;;  %p128_p0 = scmp.ne.s32.totalorder %s906_s20, %s902_s19 }
   0x8   : > { %p116_p1 = scmp.eq.s32.totalorder %s115_s26, 0  ;;  %p129_p2 = scmp.eq.s32.totalorder %s972_s22, 3 }
   0x9   : > { %p134_p3 = scmp.ne.s32.totalorder %s902_s19, %s898_s18  ;;  %p135_p4 = scmp.eq.s32.totalorder %s687_s23, 3 }
   0xa   : > { %s987_s27 = scalar_select %p116_p1, %s906_s20, %s118_s25  }
   0xb   : > { %p989_p5 = por %p129_p2, %p128_p0  ;;  %p993_p6 = por %p135_p4, %p134_p3 }
   0xc   : > { %p690_p7 = scmp.ge.s32.totalorder %s910_s21, 1  ;;  %p196_p8 = scmp.lt.s32.totalorder %s910_s21, 5 }
   0xe   : > { %p197_p9 = pnand %p690_p7, %p196_p8 }
   0xf   : > { %v239_v0 = vld [vmem:[%s1117_s2] sm:$0x1f] (!%p197_p9)  ;;  %vm254_vm0 = vcmask (!%p197_p9), 1044480   ;;  %p228_p10 = scmp.lt.s32.totalorder (!%p197_p9), %s972_s22, 3  ;;  %v236_v2 = vld [vmem:[%s1116_s1 + $0x8] sm:$0xff] (!%p197_p9)  ;;  %vm247_vm1 = vcmask (!%p197_p9), 39936  }
  0x10   : > { %200 = sbr.rel (%p197_p9) target bundleno = 1243 (0x4db), region = 36  ;;  %723 = vmatprep.subr.msk.mxu0 (!%p197_p9), %vm254_vm0, %v239_v0  ;;  %v235_v1 = vld [vmem:[%s1116_s1] sm:$0xff] (!%p197_p9)  ;;  %s912_s23 = smov (!%p197_p9), 123   ;;  %vm743_vm2 = vmpackc.low (!%p197_p9), %vm247_vm1, %vm247_vm1  ;;  %vm422_vm3 = vcmask (!%p197_p9), 130048   ;;  %v914_v31 = vmov (!%p197_p9), 0.0|0.0   ;;  %vm915_vm4 = vmmov (!%p197_p9), 0  }
  0x11   : > { %724 = vmatpush3.msk.msra.mxu0 (!%p197_p9), %vm254_vm0, %v239_v0  ;;  %v694_v7 = vld [vmem:[%s1118_s3] ss:$0 sm:$0xff] (!%p197_p9)  ;;  %s913_s25 = smov (!%p197_p9), 118   ;;  %v916_v32 = vmov (!%p197_p9), 0.0   ;;  %s1027_s26 = sand.u32 (!%p197_p9), 1, %s902_s19   ;;  %vm750_vm5 = vmpackc.low (!%p197_p9), %vm422_vm3, %vm422_vm3 }
  0x12   : > { %748 = vmatprep.subr.bf16.mxu0 (!%p197_p9), %v914_v31  ;;  %s691_s30 = sshll.u32 (!%p197_p9), %s1027_s26, 4  ;;  %s571_s12 = scalar_lea.sflag (!%p197_p9), [#allocation5], %s1027_s26 }
  0x13   : > { %s227_s6 = scalar_lea.vmem (!%p197_p9), [#allocation4], %s691_s30  ;;  %s917_s14 = smov (!%p197_p9), [#allocation4]  }
  0x17   : > { %s229_s7 = scalar_select %p228_p10, %s972_s22, 3 }
  0x19   : > { %s711_s8 = sshll.u32 %s229_s7, 4  ;;  %s712_s7 = sshll.u32 %s972_s22, 8 }
  0x1a   : > { %s232_s15 = scalar_lea.vmem %s1115_s0, %s711_s8  ;;  %s597_s8 = sshll.u32 %s227_s6, 4  ;;  %s1041_s8 = int_to_ptr.vmem [resolvable:$true] %s597_s8 }
  0x1b   : > { %v233_v3 = vld [vmem:[%s232_s15] sm:$0xff]  ;;  %v234_v4 = vld [vmem:[%s232_s15 + $0x8] sm:$0xff]  ;;  %s1039_s11 = scalar_lea.hbm %s1120_s5, %s712_s7  ;;  %s816_s13 = scalar_lea.vmem %s1041_s8, 256 }
  0x1c   : > { %v237_v5 = vadd.f32 %v235_v1, %v233_v3  ;;  %v238_v6 = vadd.f32 %v236_v2, %v234_v4  ;;  %p817_p11 = scmp.ne.s32.totalorder %s1041_s8, %s816_s13  ;;  %s820_s15 = sshll.u32 %s917_s14, 4  ;;  %s821_s15 = int_to_ptr.vmem [resolvable:$false] %s820_s15 }
  0x1d   : > { %s822_s16 = scalar_lea.vmem %s821_s15, 512  ;;  %p823_p0 = scmp.lt.s32.totalorder %s1041_s8, %s821_s15 }
  0x1e   : > { %725 = vmatprep.mubr.msk.f32.mxu0 %vm247_vm1, %v237_v5  ;;  %p818_p12 = pnand %p817_p11, %p989_p5  ;;  %p824_p1 = scmp.lt.s32.totalorder %s822_s16, %s816_s13 }
  0x1f   : > { %726 = vmatmul.mubr.msk.f32.vlgmr.msra.gmra.mrb[0].mxu0 %vm247_vm1, %v238_v6 }
  0x20   : > { %739 = vmatprep.mubr.msk.f32.mxu0 %vm915_vm4, %v916_v32  ;;  %p819_p13 = pneg %p818_p12  ;;  %p825_p2 = por %p824_p1, %p823_p0 }
  0x22   : > { %p826_p3 = pnand %p825_p2, %p819_p13 }
  0xf2   : > { %v727_v8 = vpop.f32.mrb[0].mxu0 }
  0xf3   : > { %v330_v9 = vadd.f32 %v727_v8, %v694_v7  ;;  %v324_v10 = vpop.f32.mrb[1].mxu0 }
  0xf4   : > { %v325_v11 = vadd.f32 %v694_v7, %v324_v10 }
  0xf6   : > { %732 = vmatprep.mubr.msk.f32.mxu1 %vm247_vm1, %v325_v11  ;;  %v803_v12 = vpack.i.bf16 %v330_v9, %v325_v11 }
  0xf8   : > { %804 = vrot.lane.b32.xlu0 %v803_v12, %s912_s23 }
 0x16a   : > { %v805_v13 = vpop.permute.xlu0 %804 }
 0x16b   : > { %v807_v14 = vunpack.i.h.bf16 %v805_v13  ;;  %v806_v15 = vunpack.i.l.bf16 %v805_v13 }
 0x16d   : > { %v742_v16 = vpack.c.bf16 %v807_v14, %v806_v15 }
 0x16f   : > { %744 = vmatprep.subr.msk.bf16.mxu1 %vm743_vm2, %v742_v16 }
 0x170   : > { %747 = vmatpush3.bf16.xpose.msk.msra.mxu1 %vm743_vm2, %v742_v16 }
 0x177   : > { %733 = vmatmul.mubr.msk.f32.vlgmr.msra.gmra.mrb[0].mxu1 %vm247_vm1, %v330_v9 }
 0x24a   : > { %v734_v17 = vpop.f32.mrb[0].mxu1 }
 0x24b   : > { %v413_v18 = vpop.f32.mrb[1].mxu1  ;;  %v426_v19 = vsel %vm422_vm3, %v734_v17, -inf }
 0x24c   : > { %427 = vmax.xlane.f32.xlu1 %v426_v19  ;;  %v423_v20 = vsel %vm422_vm3, %v413_v18, -inf }
 0x24d   : > { %424 = vmax.xlane.f32.xlu0 %v423_v20 }
 0x25d   : > { %447 = vrot.lane.b32.xlu1 %v325_v11, %s913_s25 }
 0x2d9   : > { %v428_v21 = vpop.xlane.xlu1 %427 }
 0x2da   : > { %v430_v22 = vsub.f32 %v734_v17, %v428_v21  ;;  %v425_v23 = vpop.xlane.xlu0 %424 }
 0x2db   : > { %v429_v24 = vsub.f32 %v413_v18, %v425_v23 }
 0x2dc   : > { %v433_v25 = vmul.f32 1.442695, %v430_v22 }
 0x2dd   : > { %v431_v26 = vmul.f32 1.442695, %v429_v24  ;;  %v448_v33 = vpop.permute.xlu1 %447 }
 0x2de   : > { %808 = vpow2.f32 %v433_v25 }
 0x2df   : > { %810 = vpow2.f32 %v431_v26 }
 0x2e8   : > { %v809_v27 = vpop.eup %808 }
 0x2e9   : > { %v811_v28 = vpop.eup %810  ;;  %v438_v29 = vsel %vm422_vm3, %v809_v27, 0.0 }
 0x2ea   : > { %439 = vadd.xlane.f32.xlu0 %v438_v29  ;;  %v435_v30 = vsel %vm422_vm3, %v811_v28, 0.0 }
 0x2eb   : > { %436 = vadd.xlane.f32.xlu1 %v435_v30 }
 0x300   : > { %449 = vrot.lane.b32.xlu0 %v330_v9, %s913_s25 }
 0x31e   : > { %453 = vxpose.xlu1.b32.start [1/2] (short) (narrow) %v448_v33, 8 }
 0x377   : > { %v440_v34 = vpop.xlane.xlu0 %439 }
 0x378   : > { %812 = vrcp.f32 %v440_v34  ;;  %v437_v35 = vpop.xlane.xlu1 %436 }
 0x379   : > { %814 = vrcp.f32 %v437_v35 }
 0x37b   : > { %v450_v36 = vpop.permute.xlu0 %449 }
 0x37c   : > { %454 = vxpose.xlu1.b32.end [2/2] (short) (narrow) %v450_v36, 8 }
 0x382   : > { %v813_v37 = vpop.eup %812 }
 0x383   : > { %v815_v38 = vpop.eup %814  ;;  %v444_v39 = vmul.f32 %v813_v37, %v809_v27 }
 0x384   : > { %v443_v40 = vmul.f32 %v815_v38, %v811_v28 }
 0x385   : > { %446 = vst.msk [vmem:[%s227_s6 + $0x8] sm:$0xff] %vm422_vm3, %v444_v39 }
 0x386   : > { %v749_v41 = vpack.c.bf16 %v444_v39, %v443_v40  ;;  %445 = vst.msk [vmem:[%s227_s6] sm:$0xff] %vm422_vm3, %v443_v40 }
 0x388   : > { %751 = vmatpush3.bf16.xpose.msk.msra.mxu0 %vm750_vm5, %v749_v41 }
 0x3f8   : > { %v469_v42 = vpop.trf.xlu1 }
 0x3f9   : > { %740 = vmatmul.mubr.msk.f32.vlgmr.msra.gmra.mrb[2].mxu0 %vm422_vm3, %v469_v42 }
 0x3fa   : > { %829 = shalt.err (!%p826_p3)
}
 0x3fb   : > { %s830_s17 = scalar_lea.hbm %s1039_s11, 256  ;;  %s834_s30 = scalar_lea.hbm %s1120_s5, 1024 }
 0x3fc   : > { %p831_p4 = scmp.ne.s32.totalorder %s1039_s11, %s830_s17  ;;  %p835_p9 = scmp.lt.u32.totalorder %s1039_s11, %s1120_s5 }
 0x3fd   : > { %p836_p10 = scmp.lt.u32.totalorder %s834_s30, %s830_s17  ;;  %p838_p12 = scmp.lt.u32.totalorder %s830_s17, %s1039_s11 }
 0x3fe   : > { %p832_p7 = pnand %p831_p4, %p989_p5 }
 0x3ff   : > { %p837_p11 = por %p836_p10, %p835_p9 }
 0x400   : > { %p833_p8 = pneg %p832_p7 }
 0x401   : > { %p839_p13 = por %p838_p12, %p837_p11 }
 0x403   : > { %p840_p0 = pnand %p839_p13, %p833_p8 }
 0x405   : > { %843 = shalt.err (!%p840_p0)
}
 0x406   : > { %s918_s9 = smov 128   ;;  %s919_s10 = smov 8   ;;  %vm564_vm6 = vcmask 122880  }
 0x407   : > { %753 = dma.vmem_to_hbm [thread:$0]  (%p989_p5), %s1041_s8, 256, %s1039_s11, %s571_s12, %s918_s9, %s918_s9, %s919_s10  }
 0x408   : > { %s706_s13 = sshll.u32 %s972_s22, 4  ;;  %s220_s14 = scalar_lea.vmem [#allocation2], %s1027_s26 }
 0x409   : > { %s584_s15 = sshll.u32 %s220_s14, 4  ;;  %s1072_s23 = scalar_lea.hbm %s1119_s4, %s706_s13  ;;  %s1074_s15 = int_to_ptr.vmem [resolvable:$true] %s584_s15 }
 0x40a   : > { %s567_s25 = scalar_lea.sflag [#allocation3], %s1027_s26  ;;  %s844_s30 = scalar_lea.vmem %s1074_s15, 16 }
 0x40b   : > { %p845_p1 = scmp.ne.s32.totalorder %s1074_s15, %s844_s30  ;;  %s920_s22 = smov [#allocation2]  }
 0x40c   : > { %s848_s8 = sshll.u32 %s920_s22, 4  ;;  %s849_s8 = int_to_ptr.vmem [resolvable:$false] %s848_s8 }
 0x40d   : > { %p846_p2 = pnand %p845_p1, %p989_p5  ;;  %s850_s11 = scalar_lea.vmem %s849_s8, 32 }
 0x40e   : > { %p851_p4 = scmp.lt.s32.totalorder %s1074_s15, %s849_s8  ;;  %p852_p7 = scmp.lt.s32.totalorder %s850_s11, %s844_s30 }
 0x40f   : > { %p847_p3 = pneg %p846_p2 }
 0x410   : > { %p853_p8 = por %p852_p7, %p851_p4 }
 0x412   : > { %p854_p9 = pnand %p853_p8, %p847_p3 }
 0x4cc   : > { %v560_v43 = vpop.f32.mrb[2].mxu0 }
 0x4cd   : > { %565 = vst.msk [vmem:[%s220_s14] sm:$0x1] %vm564_vm6, %v560_v43  ;;  %v741_v44 = vpop.f32.mrb[3].mxu0 }
 0x4ce   : > { %857 = shalt.err (!%p854_p9)
}
 0x4cf   : > { %s858_s26 = scalar_lea.hbm %s1072_s23, 16  ;;  %s862_s7 = scalar_lea.hbm %s1119_s4, 64 }
 0x4d0   : > { %p859_p10 = scmp.ne.s32.totalorder %s1072_s23, %s858_s26  ;;  %p863_p13 = scmp.lt.u32.totalorder %s1072_s23, %s1119_s4 }
 0x4d1   : > { %p864_p0 = scmp.lt.u32.totalorder %s862_s7, %s858_s26  ;;  %p866_p2 = scmp.lt.u32.totalorder %s858_s26, %s1072_s23 }
 0x4d2   : > { %p860_p11 = pnand %p859_p10, %p989_p5 }
 0x4d3   : > { %p865_p1 = por %p864_p0, %p863_p13 }
 0x4d4   : > { %p861_p12 = pneg %p860_p11 }
 0x4d5   : > { %p867_p3 = por %p866_p2, %p865_p1 }
 0x4d7   : > { %p868_p4 = pnand %p867_p3, %p861_p12 }
 0x4d9   : > { %871 = shalt.err (!%p868_p4)
}
 0x4da   : > { %752 = dma.vmem_to_hbm [thread:$0]  (%p989_p5), %s1074_s15, 16, %s1072_s23, %s567_s25  }
 0x4db PF: > { %p763_p7 = scmp.ge.s32.totalorder %s910_s21, 2  ;;  %s612_s13 = sand.u32 1, %s898_s18  }
 0x4dc   : > { %s613_s14 = scalar_lea.sflag [#allocation3], %s612_s13 }
 0x4dd   : > { %p757_p8 = pnand %p763_p7, %p993_p6 }
 0x4df   : > { %889 = dma.done.wait (!%p757_p8), %s613_s14, 16  }
 0x4e0   : > { %891 = vsyncadd (!%p757_p8), %s613_s14, 4294967280  ;;  %s621_s16 = scalar_lea.sflag [#allocation5], %s612_s13 }
 0x4e1   : > { %893 = dma.done.wait (!%p757_p8), %s621_s16, 256  }
 0x4e2   : > { %895 = vsyncadd (!%p757_p8), %s621_s16, 4294967040  ;;  %p19_p5 = scmp.ge.s32.totalorder %s976_s24, 6   ;;  %s1123_s18 = smov %s902_s19 }
 0x4e3   : > { %s1124_s19 = smov %s906_s20  ;;  %s1125_s20 = smov %s987_s27 }
 0x4e4   : > { %s1126_s21 = smov %s976_s24  ;;  %21 = sbr.rel (!%p19_p5) target bundleno = 5 (0x5), region = 88 }
 0x4eb   :  { %626 = vsyncpa [#allocation3], 1 }
 0x4ec   :  { %628 = vsyncpa [#allocation3 + $0x1], 1 }
 0x4ed   :  { %629 = vsyncpa [#allocation5], 1 }
 0x4ee   :  { %631 = vsyncpa [#allocation5 + $0x1], 1 }

</bundles_post_ra>
